<compile_context>
chip_gen: v6e
topology: v6e:2x2x1
jax: 0.10.0
libtpu: 0.0.40
codegen_flags: <defaults>
</compile_context>

<pallas_src>
import functools

import jax
import jax.numpy as jnp
from jax import lax
from jax.experimental import pallas as pl
from jax.experimental.pallas import tpu as pltpu

MARGIN_CONFIG = 5.0
_NEG_BIG = -1e30  # large finite negative (avoid inf-inf NaNs under masking)


def _triplet_loss_kernel(emb_ref,        # (B, D) VMEM, native dtype
                         lab_col_ref,    # (B, 1) int32 VMEM
                         lab_row_ref,    # (1, B) int32 VMEM
                         out_ref,        # (1, 1) f32
                         ap_ref,         # (B, B) f32 VMEM scratch: masked d_ap + margin
                         *, margin, squared):
    B = emb_ref.shape[0]
    neg_big = jnp.float32(_NEG_BIG)

    # ---- pairwise squared distances via Gram matrix (MXU) ----
    e = emb_ref[...]
    dot = lax.dot_general(e, e, (((1,), (1,)), ((), ())),
                          preferred_element_type=jnp.float32)   # (B, B) f32

    row_ids = lax.broadcasted_iota(jnp.int32, (B, B), 0)
    col_ids = lax.broadcasted_iota(jnp.int32, (B, B), 1)
    eye = row_ids == col_ids

    # square_norm from the dot diagonal for BOTH row and col -> dists is exactly
    # symmetric (and matches torch.diag(dot_product)).
    diag_only = jnp.where(eye, dot, 0.0)
    sq_col = jnp.sum(diag_only, axis=1, keepdims=True)          # (B, 1)
    sq_row = jnp.sum(diag_only, axis=0, keepdims=True)          # (1, B)

    dists = jnp.maximum(sq_col - 2.0 * dot + sq_row, 0.0)       # (B, B), symmetric
    if not squared:
        zero_mask = dists == 0.0
        dists = jnp.sqrt(jnp.where(zero_mask, 1e-16, dists))
        dists = jnp.where(zero_mask, 0.0, dists)

    # ---- one-time masked matrices (orientation free: everything is symmetric) ----
    label_eq = lab_col_ref[...] == lab_row_ref[...]              # (B, B)
    # ap_masked[p, a]: valid iff lab[a]==lab[p] and a != p
    ap_ref[...] = jnp.where(jnp.logical_and(label_eq, jnp.logical_not(eye)),
                            dists + margin, neg_big)
    # neg_term[n, a]: valid iff lab[a] != lab[n]   (implies a != n)
    neg_term = jnp.where(label_eq, neg_big, -dists)

    # ---- O(B^3) loop over positive index p: slice + add + relu + accumulate ----
    def body(p, carry):
        acc_loss, acc_pos = carry
        ap_row = ap_ref[pl.ds(p, 1), :]                          # (1, B)
        tl = jnp.maximum(ap_row + neg_term, 0.0)                 # (B, B): [n, a]
        acc_loss = acc_loss + tl
        acc_pos = acc_pos + jnp.where(tl > 1e-16, 1.0, 0.0)
        return acc_loss, acc_pos

    zeros = jnp.zeros((B, B), jnp.float32)
    acc_loss, acc_pos = lax.fori_loop(0, B, body, (zeros, zeros),
                                      unroll=min(B, 8))

    # ---- single final reduction ----
    loss_sum = jnp.sum(acc_loss, keepdims=True)                  # (1, 1)
    pos_cnt = jnp.sum(acc_pos, keepdims=True)                    # (1, 1)
    out_ref[...] = loss_sum / (pos_cnt + 1e-16)


def triplet_loss(embeddings, labels, margin=MARGIN_CONFIG, squared=False):
    """Batch-all triplet loss; returns a scalar f32 (matches the PyTorch module)."""
    B, D = embeddings.shape
    labels_i32 = labels.reshape(B).astype(jnp.int32)
    lab_col = labels_i32.reshape(B, 1)
    lab_row = labels_i32.reshape(1, B)

    out = pl.pallas_call(
        functools.partial(_triplet_loss_kernel,
                          margin=float(margin), squared=squared),
        out_shape=jax.ShapeDtypeStruct((1, 1), jnp.float32),
        grid=(1,),
        in_specs=[
            pl.BlockSpec((B, D), lambda i: (0, 0)),
            pl.BlockSpec((B, 1), lambda i: (0, 0)),
            pl.BlockSpec((1, B), lambda i: (0, 0)),
        ],
        out_specs=pl.BlockSpec((1, 1), lambda i: (0, 0)),
        scratch_shapes=[
            pltpu.VMEM((B, B), jnp.float32),   # ap_masked (only (B,B) scratch)
        ],
        compiler_params=pltpu.CompilerParams(
            dimension_semantics=("arbitrary",),
            vmem_limit_bytes=32 * 1024 * 1024,
        ),
    )(embeddings, lab_col, lab_row)
    return out[0, 0]


# --- pure-JAX reference (mirror of the PyTorch code) for a sanity check ---
def _reference_triplet_loss(labels, embeddings, margin=MARGIN_CONFIG,
                            squared=False):
    dot = embeddings @ embeddings.T
    sq = jnp.diag(dot)
    d = sq[:, None] - 2.0 * dot + sq[None, :]
    d = jnp.maximum(d, 0.0)
    if not squared:
        m = (d == 0.0).astype(jnp.float32)
        d = jnp.sqrt(d + m * 1e-16) * (1.0 - m)
    ap = d[:, :, None]
    an = d[:, None, :]
    tl = ap - an + margin
    B = labels.shape[0]
    ne = ~jnp.eye(B, dtype=bool)
    distinct = ne[:, :, None] & ne[:, None, :] & ne[None, :, :]
    leq = labels[None, :] == labels[:, None]
    valid = leq[:, :, None] & ~leq[:, None, :]
    mask = distinct & valid
    tl = jnp.maximum(tl * mask.astype(jnp.float32), 0.0)
    num_pos = jnp.sum((tl > 1e-16).astype(jnp.float32))
    return jnp.sum(tl) / (num_pos + 1e-16)


if __name__ == "__main__":
    key = jax.random.PRNGKey(0)
    k1, k2 = jax.random.split(key)
    B, D = 8, 32
    embeddings = jax.random.normal(k1, (B, D), dtype=jnp.float32)
    labels = jax.random.randint(k2, (B,), 0, 3, dtype=jnp.int32)

    loss = triplet_loss(embeddings, labels)
    jax.block_until_ready(loss)

    ref = _reference_triplet_loss(labels, embeddings)
    assert jnp.allclose(loss, ref, rtol=1e-3, atol=1e-4), (loss, ref)

    print("KERNEL_OK")
</pallas_src>

<mosaic_0001>
module attributes {stable_mosaic.version = 11 : i64} {
  func.func @_triplet_loss_kernel(%arg0: i32, %arg1: memref<8x32xf32, #tpu.memory_space<vmem>>, %arg2: memref<8x1xi32, #tpu.memory_space<vmem>>, %arg3: memref<1x8xi32, #tpu.memory_space<vmem>>, %arg4: memref<1x1xf32, #tpu.memory_space<vmem>>, %arg5: memref<8x8xf32, #tpu.memory_space<vmem>>) attributes {dimension_semantics = [#tpu.dimension_semantics<arbitrary>], iteration_bounds = array<i64: 1>, scalar_prefetch = 0 : i64, scratch_operands = 1 : i64, tpu.core_type = #tpu.core_type<tc>, window_params = [{pipeline_mode = #tpu.pipeline_mode<synchronous>, transform_indices = @transform_0, window_bounds = array<i64: 8, 32>}, {pipeline_mode = #tpu.pipeline_mode<synchronous>, transform_indices = @transform_1, window_bounds = array<i64: 8, 1>}, {pipeline_mode = #tpu.pipeline_mode<synchronous>, transform_indices = @transform_2, window_bounds = array<i64: 1, 8>}, {pipeline_mode = #tpu.pipeline_mode<synchronous>, transform_indices = @transform_3, window_bounds = array<i64: 1, 1>}]} {
    %c0 = arith.constant 0 : index
    %c0_0 = arith.constant 0 : index
    %0 = vector.load %arg1[%c0, %c0_0] : memref<8x32xf32, #tpu.memory_space<vmem>>, vector<8x32xf32>
    %cst = arith.constant dense<0.000000e+00> : vector<8x8xf32>
    %1 = tpu.matmul %0, %0, %cst {dimension_numbers = #tpu.dot_dimension_numbers<[1], [1], [0], [0], [0, 0, 1, 0], [], []>} : vector<8x32xf32>, vector<8x32xf32>, vector<8x8xf32> -> vector<8x8xf32>
    %2 = tpu.iota {dimensions = array<i32: 0>} : vector<8x8xi32>
    %3 = tpu.iota {dimensions = array<i32: 1>} : vector<8x8xi32>
    %4 = arith.cmpi eq, %2, %3 : vector<8x8xi32>
    %cst_1 = arith.constant 0.000000e+00 : f32
    %5 = vector.broadcast %cst_1 : f32 to vector<8x8xf32>
    %6 = arith.select %4, %1, %5 : vector<8x8xi1>, vector<8x8xf32>
    %cst_2 = arith.constant dense<0.000000e+00> : vector<8xf32>
    %7 = vector.multi_reduction <add>, %6, %cst_2 [1] : vector<8x8xf32> to vector<8xf32>
    %8 = vector.shape_cast %7 : vector<8xf32> to vector<8x1xf32>
    %cst_3 = arith.constant dense<0.000000e+00> : vector<8xf32>
    %9 = vector.multi_reduction <add>, %6, %cst_3 [0] : vector<8x8xf32> to vector<8xf32>
    %10 = vector.shape_cast %9 : vector<8xf32> to vector<1x8xf32>
    %cst_4 = arith.constant 2.000000e+00 : f32
    %11 = vector.broadcast %cst_4 : f32 to vector<8x8xf32>
    %12 = arith.mulf %11, %1 : vector<8x8xf32>
    %13 = vector.broadcast %8 : vector<8x1xf32> to vector<8x8xf32>
    %14 = arith.subf %13, %12 : vector<8x8xf32>
    %15 = vector.broadcast %10 : vector<1x8xf32> to vector<8x8xf32>
    %16 = arith.addf %14, %15 : vector<8x8xf32>
    %cst_5 = arith.constant 0.000000e+00 : f32
    %17 = vector.broadcast %cst_5 : f32 to vector<8x8xf32>
    %18 = arith.maximumf %16, %17 : vector<8x8xf32>
    %cst_6 = arith.constant 0.000000e+00 : f32
    %19 = vector.broadcast %cst_6 : f32 to vector<8x8xf32>
    %20 = arith.cmpf oeq, %18, %19 : vector<8x8xf32>
    %cst_7 = arith.constant 1.000000e-16 : f32
    %21 = vector.broadcast %cst_7 : f32 to vector<8x8xf32>
    %22 = arith.select %20, %21, %18 : vector<8x8xi1>, vector<8x8xf32>
    %23 = math.sqrt %22 : vector<8x8xf32>
    %cst_8 = arith.constant 0.000000e+00 : f32
    %24 = vector.broadcast %cst_8 : f32 to vector<8x8xf32>
    %25 = arith.select %20, %24, %23 : vector<8x8xi1>, vector<8x8xf32>
    %c0_9 = arith.constant 0 : index
    %c0_10 = arith.constant 0 : index
    %26 = vector.load %arg2[%c0_9, %c0_10] : memref<8x1xi32, #tpu.memory_space<vmem>>, vector<8x1xi32>
    %c0_11 = arith.constant 0 : index
    %c0_12 = arith.constant 0 : index
    %27 = vector.load %arg3[%c0_11, %c0_12] : memref<1x8xi32, #tpu.memory_space<vmem>>, vector<1x8xi32>
    %28 = vector.broadcast %26 : vector<8x1xi32> to vector<8x8xi32>
    %29 = vector.broadcast %27 : vector<1x8xi32> to vector<8x8xi32>
    %30 = arith.cmpi eq, %28, %29 : vector<8x8xi32>
    %cst_13 = arith.constant dense<true> : vector<8x8xi1>
    %31 = arith.xori %4, %cst_13 : vector<8x8xi1>
    %32 = arith.andi %30, %31 : vector<8x8xi1>
    %cst_14 = arith.constant 5.000000e+00 : f32
    %33 = vector.broadcast %cst_14 : f32 to vector<8x8xf32>
    %34 = arith.addf %25, %33 : vector<8x8xf32>
    %cst_15 = arith.constant -1.000000e+30 : f32
    %35 = vector.broadcast %cst_15 : f32 to vector<8x8xf32>
    %36 = arith.select %32, %34, %35 : vector<8x8xi1>, vector<8x8xf32>
    %c0_16 = arith.constant 0 : index
    %c0_17 = arith.constant 0 : index
    %37 = vector.load %arg5[%c0_16, %c0_17] : memref<8x8xf32, #tpu.memory_space<vmem>>, vector<8x8xf32>
    tpu.vector_store %arg5[%c0_16, %c0_17], %36 {strides = array<i32>} : memref<8x8xf32, #tpu.memory_space<vmem>>, vector<8x8xf32>,
    %cst_18 = arith.constant 0.000000e+00 : f32
    %38 = vector.broadcast %cst_18 : f32 to vector<8x8xf32>
    %39 = arith.subf %38, %25 : vector<8x8xf32>
    %cst_19 = arith.constant -1.000000e+30 : f32
    %40 = vector.broadcast %cst_19 : f32 to vector<8x8xf32>
    %41 = arith.select %30, %40, %39 : vector<8x8xi1>, vector<8x8xf32>
    %cst_20 = arith.constant 0.000000e+00 : f32
    %42 = vector.broadcast %cst_20 : f32 to vector<8x8xf32>
    %c0_i32 = arith.constant 0 : i32
    %43 = arith.index_cast %c0_i32 : i32 to index
    %c0_21 = arith.constant 0 : index
    %44 = vector.load %arg5[%43, %c0_21] : memref<8x8xf32, #tpu.memory_space<vmem>>, vector<1x8xf32>
    %45 = vector.broadcast %44 : vector<1x8xf32> to vector<8x8xf32>
    %46 = arith.addf %45, %41 : vector<8x8xf32>
    %cst_22 = arith.constant 0.000000e+00 : f32
    %47 = vector.broadcast %cst_22 : f32 to vector<8x8xf32>
    %48 = arith.maximumf %46, %47 : vector<8x8xf32>
    %49 = arith.addf %42, %48 : vector<8x8xf32>
    %cst_23 = arith.constant 1.000000e-16 : f32
    %50 = vector.broadcast %cst_23 : f32 to vector<8x8xf32>
    %51 = arith.cmpf ogt, %48, %50 : vector<8x8xf32>
    %cst_24 = arith.constant 1.000000e+00 : f32
    %cst_25 = arith.constant 0.000000e+00 : f32
    %52 = vector.broadcast %cst_24 : f32 to vector<8x8xf32>
    %53 = vector.broadcast %cst_25 : f32 to vector<8x8xf32>
    %54 = arith.select %51, %52, %53 : vector<8x8xi1>, vector<8x8xf32>
    %55 = arith.addf %42, %54 : vector<8x8xf32>
    %c1_i32 = arith.constant 1 : i32
    %56 = arith.index_cast %c1_i32 : i32 to index
    %c0_26 = arith.constant 0 : index
    %57 = vector.load %arg5[%56, %c0_26] : memref<8x8xf32, #tpu.memory_space<vmem>>, vector<1x8xf32>
    %58 = vector.broadcast %57 : vector<1x8xf32> to vector<8x8xf32>
    %59 = arith.addf %58, %41 : vector<8x8xf32>
    %cst_27 = arith.constant 0.000000e+00 : f32
    %60 = vector.broadcast %cst_27 : f32 to vector<8x8xf32>
    %61 = arith.maximumf %59, %60 : vector<8x8xf32>
    %62 = arith.addf %49, %61 : vector<8x8xf32>
    %cst_28 = arith.constant 1.000000e-16 : f32
    %63 = vector.broadcast %cst_28 : f32 to vector<8x8xf32>
    %64 = arith.cmpf ogt, %61, %63 : vector<8x8xf32>
    %cst_29 = arith.constant 1.000000e+00 : f32
    %cst_30 = arith.constant 0.000000e+00 : f32
    %65 = vector.broadcast %cst_29 : f32 to vector<8x8xf32>
    %66 = vector.broadcast %cst_30 : f32 to vector<8x8xf32>
    %67 = arith.select %64, %65, %66 : vector<8x8xi1>, vector<8x8xf32>
    %68 = arith.addf %55, %67 : vector<8x8xf32>
    %c2_i32 = arith.constant 2 : i32
    %69 = arith.index_cast %c2_i32 : i32 to index
    %c0_31 = arith.constant 0 : index
    %70 = vector.load %arg5[%69, %c0_31] : memref<8x8xf32, #tpu.memory_space<vmem>>, vector<1x8xf32>
    %71 = vector.broadcast %70 : vector<1x8xf32> to vector<8x8xf32>
    %72 = arith.addf %71, %41 : vector<8x8xf32>
    %cst_32 = arith.constant 0.000000e+00 : f32
    %73 = vector.broadcast %cst_32 : f32 to vector<8x8xf32>
    %74 = arith.maximumf %72, %73 : vector<8x8xf32>
    %75 = arith.addf %62, %74 : vector<8x8xf32>
    %cst_33 = arith.constant 1.000000e-16 : f32
    %76 = vector.broadcast %cst_33 : f32 to vector<8x8xf32>
    %77 = arith.cmpf ogt, %74, %76 : vector<8x8xf32>
    %cst_34 = arith.constant 1.000000e+00 : f32
    %cst_35 = arith.constant 0.000000e+00 : f32
    %78 = vector.broadcast %cst_34 : f32 to vector<8x8xf32>
    %79 = vector.broadcast %cst_35 : f32 to vector<8x8xf32>
    %80 = arith.select %77, %78, %79 : vector<8x8xi1>, vector<8x8xf32>
    %81 = arith.addf %68, %80 : vector<8x8xf32>
    %c3_i32 = arith.constant 3 : i32
    %82 = arith.index_cast %c3_i32 : i32 to index
    %c0_36 = arith.constant 0 : index
    %83 = vector.load %arg5[%82, %c0_36] : memref<8x8xf32, #tpu.memory_space<vmem>>, vector<1x8xf32>
    %84 = vector.broadcast %83 : vector<1x8xf32> to vector<8x8xf32>
    %85 = arith.addf %84, %41 : vector<8x8xf32>
    %cst_37 = arith.constant 0.000000e+00 : f32
    %86 = vector.broadcast %cst_37 : f32 to vector<8x8xf32>
    %87 = arith.maximumf %85, %86 : vector<8x8xf32>
    %88 = arith.addf %75, %87 : vector<8x8xf32>
    %cst_38 = arith.constant 1.000000e-16 : f32
    %89 = vector.broadcast %cst_38 : f32 to vector<8x8xf32>
    %90 = arith.cmpf ogt, %87, %89 : vector<8x8xf32>
    %cst_39 = arith.constant 1.000000e+00 : f32
    %cst_40 = arith.constant 0.000000e+00 : f32
    %91 = vector.broadcast %cst_39 : f32 to vector<8x8xf32>
    %92 = vector.broadcast %cst_40 : f32 to vector<8x8xf32>
    %93 = arith.select %90, %91, %92 : vector<8x8xi1>, vector<8x8xf32>
    %94 = arith.addf %81, %93 : vector<8x8xf32>
    %c4_i32 = arith.constant 4 : i32
    %95 = arith.index_cast %c4_i32 : i32 to index
    %c0_41 = arith.constant 0 : index
    %96 = vector.load %arg5[%95, %c0_41] : memref<8x8xf32, #tpu.memory_space<vmem>>, vector<1x8xf32>
    %97 = vector.broadcast %96 : vector<1x8xf32> to vector<8x8xf32>
    %98 = arith.addf %97, %41 : vector<8x8xf32>
    %cst_42 = arith.constant 0.000000e+00 : f32
    %99 = vector.broadcast %cst_42 : f32 to vector<8x8xf32>
    %100 = arith.maximumf %98, %99 : vector<8x8xf32>
    %101 = arith.addf %88, %100 : vector<8x8xf32>
    %cst_43 = arith.constant 1.000000e-16 : f32
    %102 = vector.broadcast %cst_43 : f32 to vector<8x8xf32>
    %103 = arith.cmpf ogt, %100, %102 : vector<8x8xf32>
    %cst_44 = arith.constant 1.000000e+00 : f32
    %cst_45 = arith.constant 0.000000e+00 : f32
    %104 = vector.broadcast %cst_44 : f32 to vector<8x8xf32>
    %105 = vector.broadcast %cst_45 : f32 to vector<8x8xf32>
    %106 = arith.select %103, %104, %105 : vector<8x8xi1>, vector<8x8xf32>
    %107 = arith.addf %94, %106 : vector<8x8xf32>
    %c5_i32 = arith.constant 5 : i32
    %108 = arith.index_cast %c5_i32 : i32 to index
    %c0_46 = arith.constant 0 : index
    %109 = vector.load %arg5[%108, %c0_46] : memref<8x8xf32, #tpu.memory_space<vmem>>, vector<1x8xf32>
    %110 = vector.broadcast %109 : vector<1x8xf32> to vector<8x8xf32>
    %111 = arith.addf %110, %41 : vector<8x8xf32>
    %cst_47 = arith.constant 0.000000e+00 : f32
    %112 = vector.broadcast %cst_47 : f32 to vector<8x8xf32>
    %113 = arith.maximumf %111, %112 : vector<8x8xf32>
    %114 = arith.addf %101, %113 : vector<8x8xf32>
    %cst_48 = arith.constant 1.000000e-16 : f32
    %115 = vector.broadcast %cst_48 : f32 to vector<8x8xf32>
    %116 = arith.cmpf ogt, %113, %115 : vector<8x8xf32>
    %cst_49 = arith.constant 1.000000e+00 : f32
    %cst_50 = arith.constant 0.000000e+00 : f32
    %117 = vector.broadcast %cst_49 : f32 to vector<8x8xf32>
    %118 = vector.broadcast %cst_50 : f32 to vector<8x8xf32>
    %119 = arith.select %116, %117, %118 : vector<8x8xi1>, vector<8x8xf32>
    %120 = arith.addf %107, %119 : vector<8x8xf32>
    %c6_i32 = arith.constant 6 : i32
    %121 = arith.index_cast %c6_i32 : i32 to index
    %c0_51 = arith.constant 0 : index
    %122 = vector.load %arg5[%121, %c0_51] : memref<8x8xf32, #tpu.memory_space<vmem>>, vector<1x8xf32>
    %123 = vector.broadcast %122 : vector<1x8xf32> to vector<8x8xf32>
    %124 = arith.addf %123, %41 : vector<8x8xf32>
    %cst_52 = arith.constant 0.000000e+00 : f32
    %125 = vector.broadcast %cst_52 : f32 to vector<8x8xf32>
    %126 = arith.maximumf %124, %125 : vector<8x8xf32>
    %127 = arith.addf %114, %126 : vector<8x8xf32>
    %cst_53 = arith.constant 1.000000e-16 : f32
    %128 = vector.broadcast %cst_53 : f32 to vector<8x8xf32>
    %129 = arith.cmpf ogt, %126, %128 : vector<8x8xf32>
    %cst_54 = arith.constant 1.000000e+00 : f32
    %cst_55 = arith.constant 0.000000e+00 : f32
    %130 = vector.broadcast %cst_54 : f32 to vector<8x8xf32>
    %131 = vector.broadcast %cst_55 : f32 to vector<8x8xf32>
    %132 = arith.select %129, %130, %131 : vector<8x8xi1>, vector<8x8xf32>
    %133 = arith.addf %120, %132 : vector<8x8xf32>
    %c7_i32 = arith.constant 7 : i32
    %134 = arith.index_cast %c7_i32 : i32 to index
    %c0_56 = arith.constant 0 : index
    %135 = vector.load %arg5[%134, %c0_56] : memref<8x8xf32, #tpu.memory_space<vmem>>, vector<1x8xf32>
    %136 = vector.broadcast %135 : vector<1x8xf32> to vector<8x8xf32>
    %137 = arith.addf %136, %41 : vector<8x8xf32>
    %cst_57 = arith.constant 0.000000e+00 : f32
    %138 = vector.broadcast %cst_57 : f32 to vector<8x8xf32>
    %139 = arith.maximumf %137, %138 : vector<8x8xf32>
    %140 = arith.addf %127, %139 : vector<8x8xf32>
    %cst_58 = arith.constant 1.000000e-16 : f32
    %141 = vector.broadcast %cst_58 : f32 to vector<8x8xf32>
    %142 = arith.cmpf ogt, %139, %141 : vector<8x8xf32>
    %cst_59 = arith.constant 1.000000e+00 : f32
    %cst_60 = arith.constant 0.000000e+00 : f32
    %143 = vector.broadcast %cst_59 : f32 to vector<8x8xf32>
    %144 = vector.broadcast %cst_60 : f32 to vector<8x8xf32>
    %145 = arith.select %142, %143, %144 : vector<8x8xi1>, vector<8x8xf32>
    %146 = arith.addf %133, %145 : vector<8x8xf32>
    %c8_i32 = arith.constant 8 : i32
    %147 = vector.shape_cast %140 : vector<8x8xf32> to vector<1x8x8xf32>
    %cst_61 = arith.constant dense<0.000000e+00> : vector<1xf32>
    %148 = vector.multi_reduction <add>, %147, %cst_61 [1, 2] : vector<1x8x8xf32> to vector<1xf32>
    %149 = vector.shape_cast %148 : vector<1xf32> to vector<1x1x1xf32>
    %150 = vector.extract %149[0, 0, 0] : f32 from vector<1x1x1xf32>
    %151 = vector.broadcast %150 : f32 to vector<1x1xf32>
    %152 = vector.shape_cast %146 : vector<8x8xf32> to vector<1x8x8xf32>
    %cst_62 = arith.constant dense<0.000000e+00> : vector<1xf32>
    %153 = vector.multi_reduction <add>, %152, %cst_62 [1, 2] : vector<1x8x8xf32> to vector<1xf32>
    %154 = vector.shape_cast %153 : vector<1xf32> to vector<1x1x1xf32>
    %155 = vector.extract %154[0, 0, 0] : f32 from vector<1x1x1xf32>
    %156 = vector.broadcast %155 : f32 to vector<1x1xf32>
    %cst_63 = arith.constant 1.000000e-16 : f32
    %157 = vector.broadcast %cst_63 : f32 to vector<1x1xf32>
    %158 = arith.addf %156, %157 : vector<1x1xf32>
    %159 = arith.divf %151, %158 : vector<1x1xf32>
    %c0_64 = arith.constant 0 : index
    %c0_65 = arith.constant 0 : index
    %160 = vector.load %arg4[%c0_64, %c0_65] : memref<1x1xf32, #tpu.memory_space<vmem>>, vector<1x1xf32>
    tpu.vector_store %arg4[%c0_64, %c0_65], %159 {strides = array<i32>} : memref<1x1xf32, #tpu.memory_space<vmem>>, vector<1x1xf32>,
    return
  }
  func.func @transform_0(%arg0: i32) -> (i32, i32) {
    %c0_i32 = arith.constant 0 : i32
    %c0_i32_0 = arith.constant 0 : i32
    %c0_i32_1 = arith.constant 0 : i32
    return %c0_i32, %c0_i32_0 : i32, i32
  }
  func.func @transform_1(%arg0: i32) -> (i32, i32) {
    %c0_i32 = arith.constant 0 : i32
    %c0_i32_0 = arith.constant 0 : i32
    %c0_i32_1 = arith.constant 0 : i32
    return %c0_i32, %c0_i32_0 : i32, i32
  }
  func.func @transform_2(%arg0: i32) -> (i32, i32) {
    %c0_i32 = arith.constant 0 : i32
    %c0_i32_0 = arith.constant 0 : i32
    %c0_i32_1 = arith.constant 0 : i32
    return %c0_i32, %c0_i32_0 : i32, i32
  }
  func.func @transform_3(%arg0: i32) -> (i32, i32) {
    %c0_i32 = arith.constant 0 : i32
    %c0_i32_0 = arith.constant 0 : i32
    %c0_i32_1 = arith.constant 0 : i32
    return %c0_i32, %c0_i32_0 : i32, i32
  }
}

</mosaic_0001>

<bundles_post_ra>
// kernel: tpu_custom_call.1
= control target key start
LH: loop header
LB: loop body
LE: loop exit
PB: predicated region body
PF: predicated region fallthrough
CT: control target
= control target key end

     0   :  { %vm16_vm0 = vcmask 261120   ;;  %s373_s0 = inlined_call_operand.vmem [shape: f32[8,32], index: 0, kind: input, shape index: {}]   ;;  %s374_s1 = inlined_call_operand.vmem [shape: s32[8,1], index: 1, kind: input, shape index: {}]   ;;  %s375_s2 = inlined_call_operand.vmem [shape: s32[1,8], index: 2, kind: input, shape index: {}]   ;;  %s376_s3 = inlined_call_operand.hbm [shape: f32[1,1], index: 3, kind: output, shape index: {}]  }
   0x1   :  { %v15_v0 = vld [vmem:[%s373_s0] sm:$0xff] }
   0x2   :  { %8 = vsyncpa [#allocation4], 0  ;;  %v320_v1 = vmov 0.0   ;;  %vm321_vm1 = vmmov 0   ;;  %v322_v2 = vmov 0   ;;  %v90_v3 = vlaneseq  ;;  %v120_v10 = vld [vmem:[%s374_s1] sm:$0xff] }
   0x3   :  { %279 = vmatprep.subr.mxu0 %v320_v1  ;;  %281 = vmatprep.mubr.msk.f32.mxu0 %vm321_vm1, %v320_v1  ;;  %vm96_vm3 = vcmask 64512   ;;  %v268_v23 = vld [vmem:[%s375_s2] ss:$0 sm:$0xff]  ;;  %vm323_vm5 = vmmov 1   ;;  %s324_s17 = smov [#allocation3]  }
   0x4   :  { %280 = vmatpush3.xpose.msk.msra.mxu0 %vm16_vm0, %v15_v0  ;;  %293 = vset.pattern.permute.xlu0 %v322_v2  ;;  %v91_v4 = vshrl.u32 %v90_v3, 7  ;;  %v93_v5 = vand.u32 127, %v90_v3  ;;  %s258_s18 = sshll.u32 %s324_s17, 4  ;;  %s259_s18 = int_to_ptr.vmem [resolvable:$true] %s258_s18 }
   0x5   :  { %s298_s19 = scalar_lea.vmem %s259_s18, 16  ;;  %s302_s20 = scalar_lea.vmem %s259_s18, 32 }
   0x6   :  { %vm94_vm2 = vcmp.eq.s32.totalorder %v91_v4, %v93_v5  ;;  %p299_p0 = scmp.ne.s32.totalorder %s259_s18, %s298_s19  ;;  %p303_p1 = scmp.lt.s32.totalorder %s259_s18, %s259_s18 }
   0x7   :  { %282 = vmatmul.mubr.msk.f32.vlgmr.msra.gmra.mxu0 %vm16_vm0, %v15_v0  ;;  %vm130_vm6 = vmxor %vm94_vm2, %vm323_vm5  ;;  %p304_p2 = scmp.lt.s32.totalorder %s302_s20, %s298_s19 }
   0x9   :  { %p305_p3 = por %p304_p2, %p303_p1 }
   0xb   :  { %p306_p4 = pnand %p305_p3, %p299_p0 }
  0xc7   :  { %v86_v6 = vpop.f32.mrf.mxu0 }
  0xc8   :  { %v95_v7 = vsel %vm94_vm2, %v86_v6, 0.0  ;;  %v106_v16 = vmul.f32 2.0, %v86_v6 }
  0xc9   :  { %v283_v8 = vpop.f32.mrf.mxu0  ;;  %v97_v9 = vsel %vm96_vm3, %v95_v7, 0.0 }
  0xca   :  { %98 = vadd.xlane.f32.xlu0 %v97_v9  ;;  %v100_v11 = vrot.slane %v97_v9, 4 }
  0xcc   :  { %v101_v12 = vadd.f32 %v100_v11, %v97_v9 }
  0xce   :  { %v102_v13 = vrot.slane %v101_v12, 2 }
  0xd0   :  { %v103_v14 = vadd.f32 %v102_v13, %v101_v12 }
  0xd2   :  { %v104_v15 = vrot.slane %v103_v14, 1 }
  0xd4   :  { %v105_v18 = vadd.f32 %v104_v15, %v103_v14 }
  0xe0   :  { %123 = vperm.xlu0 %293, %v120_v10  }
 0x153   :  { %v99_v17 = vpop.xlane.xlu0 %98 }
 0x154   :  { %v107_v19 = vsub.f32 %v99_v17, %v106_v16 }
 0x156   :  { %v108_v20 = vadd.f32 %v107_v19, %v105_v18 }
 0x158   :  { %v109_v21 = vmax.f32 %v108_v20, 0.0 }
 0x15a   :  { %vm110_vm4 = vcmp.eq.f32.partialorder %v109_v21, 0.0 }
 0x15b   :  { %v111_v22 = vsel %vm110_vm4, 1e-16, %v109_v21  ;;  %v124_v24 = vpop.permute.xlu0 %123 }
 0x15c   :  { %294 = vrsqrt.f32 %v111_v22  ;;  %vm114_vm7 = vcmp.eq.f32.partialorder %v111_v22, inf  ;;  %v117_v27 = vand.u32 2147483648, %v111_v22  ;;  %vm129_vm8 = vcmp.eq.s32.totalorder %v124_v24, %v268_v23 }
 0x15d   :  { %vm116_vm9 = vcmp.eq.f32.partialorder %v111_v22, 0.0  ;;  %vm131_vm10 = vmand %vm129_vm8, %vm130_vm6 }
 0x169   :  { %v295_v25 = vpop.eup %294 }
 0x16a   :  { %v113_v26 = vmul.f32 %v295_v25, %v111_v22 }
 0x16c   :  { %v115_v28 = vsel %vm114_vm7, %v111_v22, %v113_v26 }
 0x16d   :  { %v118_v29 = vsel %vm116_vm9, %v117_v27, %v115_v28 }
 0x16e   :  { %v119_v30 = vsel %vm110_vm4, 0.0, %v118_v29 }
 0x16f   :  { %v132_v31 = vadd.f32 5.0, %v119_v30  ;;  %v135_v33 = vsub.f32 0.0, %v119_v30 }
 0x171   :  { %v133_v32 = vsel %vm131_vm10, %v132_v31, -1e+30  ;;  %v136_v34 = vsel %vm129_vm8, -1e+30, %v135_v33 }
 0x172   :  { %134 = vst.msk [vmem:[#allocation2] sm:$0xff] %vm96_vm3, %v133_v32 }
 0x179   :  { %v269_v35 = vld [vmem:[#allocation2] ss:$0 sm:$0xff]  ;;  %v270_v36 = vld [vmem:[#allocation2 + $0x1] ss:$0 sm:$0xff]  ;;  %v271_v37 = vld [vmem:[#allocation2 + $0x2] ss:$0 sm:$0xff] }
 0x17a   :  { %v142_v38 = vadd.f32 %v269_v35, %v136_v34  ;;  %v153_v39 = vadd.f32 %v270_v36, %v136_v34  ;;  %v164_v40 = vadd.f32 %v271_v37, %v136_v34  ;;  %v272_v41 = vld [vmem:[#allocation2 + $0x3] ss:$0 sm:$0xff]  ;;  %v273_v42 = vld [vmem:[#allocation2 + $0x4] ss:$0 sm:$0xff]  ;;  %v274_v43 = vld [vmem:[#allocation2 + $0x5] ss:$0 sm:$0xff] }
 0x17b   :  { %v175_v44 = vadd.f32 %v272_v41, %v136_v34  ;;  %v186_v45 = vadd.f32 %v273_v42, %v136_v34  ;;  %v197_v46 = vadd.f32 %v274_v43, %v136_v34  ;;  %v275_v47 = vld [vmem:[#allocation2 + $0x6] ss:$0 sm:$0xff]  ;;  %v276_v53 = vld [vmem:[#allocation2 + $0x7] ss:$0 sm:$0xff] }
 0x17c   :  { %v143_v48 = vmax.f32 %v142_v38, 0.0  ;;  %v154_v49 = vmax.f32 %v153_v39, 0.0  ;;  %v165_v50 = vmax.f32 %v164_v40, 0.0  ;;  %v208_v52 = vadd.f32 %v275_v47, %v136_v34 }
 0x17d   :  { %v176_v51 = vmax.f32 %v175_v44, 0.0  ;;  %v187_v55 = vmax.f32 %v186_v45, 0.0  ;;  %v198_v56 = vmax.f32 %v197_v46, 0.0  ;;  %v219_v60 = vadd.f32 %v276_v53, %v136_v34 }
 0x17e   :  { %v155_v54 = vadd.f32 %v154_v49, %v143_v48  ;;  %vm145_vm11 = vcmp.gt.f32.partialorder %v143_v48, 1e-16  ;;  %vm156_vm12 = vcmp.gt.f32.partialorder %v154_v49, 1e-16  ;;  %vm167_vm13 = vcmp.gt.f32.partialorder %v165_v50, 1e-16 }
 0x17f   :  { %v146_v57 = vsel %vm145_vm11, 1.0, %v320_v1  ;;  %v157_v58 = vsel %vm156_vm12, 1.0, %v320_v1  ;;  %vm178_vm14 = vcmp.gt.f32.partialorder %v176_v51, 1e-16  ;;  %v168_v62 = vsel %vm167_vm13, 1.0, %v320_v1 }
 0x180   :  { %v166_v59 = vadd.f32 %v165_v50, %v155_v54  ;;  %v158_v61 = vadd.f32 %v157_v58, %v146_v57  ;;  %v209_v0 = vmax.f32 %v208_v52, 0.0  ;;  %vm189_vm15 = vcmp.gt.f32.partialorder %v187_v55, 1e-16 }
 0x181   :  { %v179_v3 = vsel %vm178_vm14, 1.0, %v320_v1  ;;  %v220_v5 = vmax.f32 %v219_v60, 0.0  ;;  %vm200_vm0 = vcmp.gt.f32.partialorder %v198_v56, 1e-16  ;;  %v190_v7 = vsel %vm189_vm15, 1.0, %v320_v1 }
 0x182   :  { %v177_v63 = vadd.f32 %v176_v51, %v166_v59  ;;  %v169_v2 = vadd.f32 %v168_v62, %v158_v61  ;;  %vm211_vm1 = vcmp.gt.f32.partialorder %v209_v0, 1e-16  ;;  %v201_v10 = vsel %vm200_vm0, 1.0, %v320_v1 }
 0x183   :  { %vm222_vm2 = vcmp.gt.f32.partialorder %v220_v5, 1e-16  ;;  %v212_v13 = vsel %vm211_vm1, 1.0, %v320_v1 }
 0x184   :  { %v188_v4 = vadd.f32 %v187_v55, %v177_v63  ;;  %v180_v6 = vadd.f32 %v179_v3, %v169_v2  ;;  %v223_v16 = vsel %vm222_vm2, 1.0, %v320_v1 }
 0x186   :  { %v199_v8 = vadd.f32 %v198_v56, %v188_v4  ;;  %v191_v9 = vadd.f32 %v190_v7, %v180_v6 }
 0x188   :  { %v210_v11 = vadd.f32 %v209_v0, %v199_v8  ;;  %v202_v12 = vadd.f32 %v201_v10, %v191_v9 }
 0x18a   :  { %v221_v14 = vadd.f32 %v220_v5, %v210_v11  ;;  %v213_v15 = vadd.f32 %v212_v13, %v202_v12 }
 0x18c   :  { %v225_v17 = vsel %vm96_vm3, %v221_v14, 0.0  ;;  %v224_v18 = vadd.f32 %v223_v16, %v213_v15 }
 0x18d   :  { %226 = vadd.xlane.f32.xlu1 %v225_v17 }
 0x18e   :  { %v236_v19 = vsel %vm96_vm3, %v224_v18, 0.0  ;;  %vm250_vm3 = vcmask 0  }
 0x191   :  { %237 = vadd.xlane.f32.xlu1 %v236_v19 }
 0x216   :  { %v227_v20 = vpop.xlane.xlu1 %226 }
 0x217   :  { %v228_v21 = vrot.slane %v227_v20, 4 }
 0x219   :  { %v229_v22 = vadd.f32 %v228_v21, %v227_v20 }
 0x21a   :  { %v238_v23 = vpop.xlane.xlu1 %237 }
 0x21b   :  { %v230_v24 = vrot.slane %v229_v22, 2  ;;  %v239_v25 = vrot.slane %v238_v23, 4 }
 0x21d   :  { %v240_v26 = vadd.f32 %v239_v25, %v238_v23  ;;  %v231_v27 = vadd.f32 %v230_v24, %v229_v22 }
 0x21f   :  { %v241_v28 = vrot.slane %v240_v26, 2  ;;  %v232_v29 = vrot.slane %v231_v27, 1 }
 0x221   :  { %v242_v30 = vadd.f32 %v241_v28, %v240_v26  ;;  %v233_v31 = vadd.f32 %v232_v29, %v231_v27 }
 0x223   :  { %284 = vpush %v233_v31  ;;  %v243_v1 = vrot.slane %v242_v30, 1 }
 0x225   :  { %v244_v32 = vadd.f32 %v243_v1, %v242_v30 }
 0x227   :  { %286 = vpush %v244_v32 }
 0x254   :  { %s285_s1 = spop %284 }
 0x255   :  { %v235_v36 = vstv %s285_s1 }
 0x258   :  { %s287_s2 = spop %286 }
 0x259   :  { %v246_v33 = vstv %s287_s2 }
 0x25a   :  { %v247_v34 = vadd.f32 1e-16, %v246_v33 }
 0x25c   :  { %296 = vrcp.f32 %v247_v34 }
 0x269   :  { %v297_v35 = vpop.eup %296 }
 0x26a   :  { %v249_v37 = vmul.f32 %v297_v35, %v235_v36 }
 0x26c   :  { %251 = vst.msk [vmem:[#allocation3] sm:$0x1] %vm250_vm3, %v249_v37 }
 0x26d   :  { %309 = shalt.err (!%p306_p4)
}
 0x26e   :  { %261 = dma.vmem_to_hbm [thread:$0]  %s259_s18, 16, %s376_s3, [#allocation4]  }
 0x26f   :  { %318 = dma.done.wait [#allocation4], 16  }
 0x270   :  { %319 = vsyncadd [#allocation4], 4294967280 }
 0x271   :  { %265 = vsyncpa [#allocation4], 1 }

</bundles_post_ra>
